<compile_context>
chip_gen: v5e
topology: v5e:2x2
jax: 0.10.0
libtpu: 0.0.40
codegen_flags: <defaults>
</compile_context>

<pallas_src>
import functools

import jax
import jax.numpy as jnp
from jax.experimental import pallas as pl
from jax.experimental.pallas import tpu as pltpu


def _identity_alias_kernel(x_ref, o_ref):
    # Output buffer IS the input buffer (input_output_aliases={0: 0}); the
    # whole forward pass of CivilCommentsTransform is `return x`, so there is
    # nothing to compute or move.
    del x_ref, o_ref


def _identity_dma_kernel(x_hbm, o_hbm, sem):
    # Single whole-array HBM->HBM DMA: no VMEM staging, no grid, no vreg work.
    cp = pltpu.make_async_copy(x_hbm, o_hbm, sem)
    cp.start()
    cp.wait()


@functools.partial(jax.jit, static_argnames=("alias",))
def civilcomments_transform(x: jax.Array, *, alias: bool = True) -> jax.Array:
    """Pallas implementation of CivilCommentsTransform.forward (identity)."""
    if x.size == 0:
        return x

    if alias:
        # Zero-cost identity: output aliases the input buffer, nothing to DMA.
        return pl.pallas_call(
            _identity_alias_kernel,
            out_shape=jax.ShapeDtypeStruct(x.shape, x.dtype),
            in_specs=[pl.BlockSpec(memory_space=pl.ANY)],
            out_specs=pl.BlockSpec(memory_space=pl.ANY),
            input_output_aliases={0: 0},
        )(x)

    # Non-aliasing copy: one direct HBM->HBM DMA (no VMEM staging / tiling).
    return pl.pallas_call(
        _identity_dma_kernel,
        out_shape=jax.ShapeDtypeStruct(x.shape, x.dtype),
        in_specs=[pl.BlockSpec(memory_space=pl.ANY)],
        out_specs=pl.BlockSpec(memory_space=pl.ANY),
        scratch_shapes=[pltpu.SemaphoreType.DMA],
    )(x)


if __name__ == "__main__":
    # CivilCommentsTransform.__init__ has no parameters, so nothing to init.
    key = jax.random.PRNGKey(0)
    k1, k2, k3 = jax.random.split(key, 3)

    # Tokenized CivilComments batch: [batch, seq] int32 token ids.
    x_tok = jax.random.randint(k1, (16, 256), minval=0, maxval=30522, dtype=jnp.int32)
    # Arbitrary-rank float tensor (the transform is shape-agnostic).
    x_f32 = jax.random.normal(k2, (2, 4, 16, 16), dtype=jnp.float32)
    # Ragged / un-aligned shape (handled identically: whole-array alias / DMA).
    x_rag = jax.random.normal(k3, (3, 50), dtype=jnp.float32)

    for x in (x_tok, x_f32, x_rag):
        for alias in (True, False):
            y = jax.block_until_ready(civilcomments_transform(x, alias=alias))
            assert y.shape == x.shape and y.dtype == x.dtype
            assert bool(jnp.all(y == x))

    print("KERNEL_OK")
</pallas_src>

<mosaic_0001>
module attributes {stable_mosaic.version = 11 : i64} {
  func.func @_identity_alias_kernel(%arg0: memref<16x256xi32, #tpu.memory_space<any>>, %arg1: memref<16x256xi32, #tpu.memory_space<any>>) attributes {dimension_semantics = [], scalar_prefetch = 0 : i64, scratch_operands = 0 : i64, tpu.core_type = #tpu.core_type<tc>} {
    return
  }
}

</mosaic_0001>

<bundles_post_ra>
// kernel: civilcomments_transform.1
= control target key start
LH: loop header
LB: loop body
LE: loop exit
PB: predicated region body
PF: predicated region fallthrough
CT: control target
= control target key end

     0   :  { %s16_s0 = inlined_call_operand.hbm [shape: s32[16,256], index: 0, kind: input, shape index: {}, may-alias: {0,1}]   ;;  %s17_s1 = inlined_call_operand.hbm [shape: s32[16,256], index: 1, kind: output, shape index: {}, may-alias: {0,1}]  }

</bundles_post_ra>
